<compile_context>
chip_gen: v6e
topology: v6e:2x2x1
jax: 0.10.0
libtpu: 0.0.40
codegen_flags: <defaults>
</compile_context>

<pallas_src>
import jax
import jax.numpy as jnp
from jax.experimental import pallas as pl
from jax.experimental.pallas import tpu as pltpu


_VMEM_LIMIT_BYTES = 32 * 1024 * 1024    # explicit scoped-VMEM ceiling (safe on all gens)
_VMEM_BUDGET_BYTES = 16 * 1024 * 1024   # allowance for our double-buffered tiles
_HBM_TRAFFIC_TARGET = 4 * 1024 * 1024   # ~4 MiB of HBM traffic per grid step


def _outconv_kernel(x_ref, w_ref, b_ref, o_ref):
    """1x1 conv over one pixel tile.

    x_ref: VMEM (1, Cin, sr, 128) [sublane-dense] or (1, Cin, tp) [lane-dense]
    w_ref: SMEM (Cout * Cin,) flattened weights
    b_ref: SMEM (Cout,)       bias
    o_ref: VMEM (1, Cout, sr, 128) or (1, Cout, tp)
    """
    cin = x_ref.shape[1]
    cout = o_ref.shape[1]

    if x_ref.ndim == 4:
        # Dense (sr, 128) pixel planes, one per input channel.
        planes = [x_ref[0, ci].astype(jnp.float32) for ci in range(cin)]

        def _store(co, v):
            o_ref[0, co] = v
    else:
        # Lane-dense fallback: keep slices 2-D, (1, tp).
        planes = [x_ref[0, ci:ci + 1, :].astype(jnp.float32) for ci in range(cin)]

        def _store(co, v):
            o_ref[0, co:co + 1, :] = v

    # One fused scalar-FMA chain per output channel: b + sum_ci w[co,ci] * x[ci].
    for co in range(cout):
        acc = planes[0] * w_ref[co * cin] + b_ref[co]
        for ci in range(1, cin):
            acc = acc + planes[ci] * w_ref[co * cin + ci]
        _store(co, acc.astype(o_ref.dtype))


def out_conv(x, weight, bias):
    """1x1 Conv2d (OutConv.forward) on NCHW input.

    x: (N, Cin, H, W) float32; weight: (Cout, Cin, 1, 1); bias: (Cout,).
    Returns (N, Cout, H, W).
    """
    N, Cin, H, W = x.shape
    Cout = weight.shape[0]
    P = H * W

    w_flat = weight.reshape(Cout * Cin)
    b_flat = bias.reshape(Cout)

    if P % 128 == 0:
        # --- Sublane-dense layout: (N, Cin, R, 128), tile the row axis. ---
        R, C = P // 128, 128
        per_row = (Cin + Cout) * C * 4                      # HBM bytes per 128-px row
        sr_traffic = max(1, _HBM_TRAFFIC_TARGET // per_row)
        sr_vmem = max(1, _VMEM_BUDGET_BYTES // (2 * per_row))   # double-buffered
        sr = min(sr_traffic, sr_vmem, R)
        if sr < R:
            sr = max(8, (sr // 8) * 8)                      # (8,128) block rule
        # v7x megacore: make sure both TensorCores get at least one block.
        if N * pl.cdiv(R, sr) < 2 and R >= 16:
            sr = max(8, ((R // 2) // 8) * 8)

        xm = x.reshape(N, Cin, R, C)                        # contiguous, free
        nb = pl.cdiv(R, sr)
        in_x_spec = pl.BlockSpec((1, Cin, sr, C), lambda n, b: (n, 0, b, 0))
        out_spec = pl.BlockSpec((1, Cout, sr, C), lambda n, b: (n, 0, b, 0))
        out_struct = jax.ShapeDtypeStruct((N, Cout, R, C), x.dtype)
    else:
        # --- Lane-dense fallback: (N, Cin, P), pixel tile multiple of 128. ---
        pad8 = lambda c: ((c + 7) // 8) * 8
        tp_traffic = max(128, _HBM_TRAFFIC_TARGET // ((Cin + Cout) * 4))
        # Padded footprint: channel axes pad to 8 sublanes in this layout.
        tp_vmem = max(128, _VMEM_BUDGET_BYTES // (2 * (pad8(Cin) + pad8(Cout)) * 4))
        tp = min(tp_traffic, tp_vmem)
        if tp >= P:
            tp = P
        else:
            tp = max(128, (tp // 128) * 128)
        if N * pl.cdiv(P, tp) < 2 and P >= 256:
            tp = max(128, ((P // 2) // 128) * 128)

        xm = x.reshape(N, Cin, P)
        nb = pl.cdiv(P, tp)
        in_x_spec = pl.BlockSpec((1, Cin, tp), lambda n, b: (n, 0, b))
        out_spec = pl.BlockSpec((1, Cout, tp), lambda n, b: (n, 0, b))
        out_struct = jax.ShapeDtypeStruct((N, Cout, P), x.dtype)

    cost = pl.CostEstimate(
        flops=2 * N * Cin * Cout * P,
        transcendentals=0,
        bytes_accessed=(Cin + Cout) * N * P * 4 + (Cout * Cin + Cout) * 4,
    )

    out = pl.pallas_call(
        _outconv_kernel,
        out_shape=out_struct,
        grid_spec=pltpu.PrefetchScalarGridSpec(
            num_scalar_prefetch=0,
            grid=(N, nb),
            in_specs=[
                in_x_spec,
                pl.BlockSpec(memory_space=pltpu.MemorySpace.SMEM),   # weights
                pl.BlockSpec(memory_space=pltpu.MemorySpace.SMEM),   # bias
            ],
            out_specs=out_spec,
        ),
        compiler_params=pltpu.CompilerParams(
            dimension_semantics=("parallel", "parallel"),
            vmem_limit_bytes=_VMEM_LIMIT_BYTES),
        cost_estimate=cost,
    )(xm, w_flat, b_flat)

    return out.reshape(N, Cout, H, W)


if __name__ == "__main__":
    key = jax.random.PRNGKey(0)
    k_x, k_w, k_b = jax.random.split(key, 3)

    N, Cin, Cout, Hs, Ws = 2, 4, 3, 16, 16
    x = jax.random.normal(k_x, (N, Cin, Hs, Ws), dtype=jnp.float32)
    # Deterministic Conv2d-style init (uniform in +-1/sqrt(fan_in)), kernel_size=1.
    bound = 1.0 / (Cin ** 0.5)
    weight = jax.random.uniform(k_w, (Cout, Cin, 1, 1), jnp.float32, -bound, bound)
    bias = jax.random.uniform(k_b, (Cout,), jnp.float32, -bound, bound)

    y = out_conv(x, weight, bias)
    jax.block_until_ready(y)

    # Reference check against plain-JAX 1x1 conv semantics.
    y_ref = (jnp.einsum("nchw,oc->nohw", x, weight.reshape(Cout, Cin))
             + bias[None, :, None, None])
    assert y.shape == (N, Cout, Hs, Ws)
    assert jnp.allclose(y, y_ref, atol=1e-5, rtol=1e-5)

    print("KERNEL_OK")
</pallas_src>

<mosaic_0001>
module attributes {stable_mosaic.version = 11 : i64} {
  func.func @_outconv_kernel(%arg0: i32, %arg1: i32, %arg2: memref<1x4x2x128xf32, #tpu.memory_space<vmem>>, %arg3: memref<12xf32, #tpu.memory_space<smem>>, %arg4: memref<3xf32, #tpu.memory_space<smem>>, %arg5: memref<1x3x2x128xf32, #tpu.memory_space<vmem>>) attributes {dimension_semantics = [#tpu.dimension_semantics<parallel>, #tpu.dimension_semantics<parallel>], iteration_bounds = array<i64: 2, 1>, scalar_prefetch = 0 : i64, scratch_operands = 0 : i64, tpu.core_type = #tpu.core_type<tc>, window_params = [{transform_indices = @transform_0, window_bounds = array<i64: 1, 4, 2, 128>}, {transform_indices = @transform_1, window_bounds = array<i64: 12>}, {transform_indices = @transform_2, window_bounds = array<i64: 3>}, {transform_indices = @transform_3, window_bounds = array<i64: 1, 3, 2, 128>}]} {
    %c0 = arith.constant 0 : index
    %c0_0 = arith.constant 0 : index
    %c0_1 = arith.constant 0 : index
    %c0_2 = arith.constant 0 : index
    %0 = vector.load %arg2[%c0, %c0_0, %c0_1, %c0_2] : memref<1x4x2x128xf32, #tpu.memory_space<vmem>>, vector<1x1x2x128xf32>
    %1 = vector.shape_cast %0 : vector<1x1x2x128xf32> to vector<2x128xf32>
    %c0_3 = arith.constant 0 : index
    %c1 = arith.constant 1 : index
    %c0_4 = arith.constant 0 : index
    %c0_5 = arith.constant 0 : index
    %2 = vector.load %arg2[%c0_3, %c1, %c0_4, %c0_5] : memref<1x4x2x128xf32, #tpu.memory_space<vmem>>, vector<1x1x2x128xf32>
    %3 = vector.shape_cast %2 : vector<1x1x2x128xf32> to vector<2x128xf32>
    %c0_6 = arith.constant 0 : index
    %c2 = arith.constant 2 : index
    %c0_7 = arith.constant 0 : index
    %c0_8 = arith.constant 0 : index
    %4 = vector.load %arg2[%c0_6, %c2, %c0_7, %c0_8] : memref<1x4x2x128xf32, #tpu.memory_space<vmem>>, vector<1x1x2x128xf32>
    %5 = vector.shape_cast %4 : vector<1x1x2x128xf32> to vector<2x128xf32>
    %c0_9 = arith.constant 0 : index
    %c3 = arith.constant 3 : index
    %c0_10 = arith.constant 0 : index
    %c0_11 = arith.constant 0 : index
    %6 = vector.load %arg2[%c0_9, %c3, %c0_10, %c0_11] : memref<1x4x2x128xf32, #tpu.memory_space<vmem>>, vector<1x1x2x128xf32>
    %7 = vector.shape_cast %6 : vector<1x1x2x128xf32> to vector<2x128xf32>
    %c0_12 = arith.constant 0 : index
    %8 = memref.load %arg3[%c0_12] : memref<12xf32, #tpu.memory_space<smem>>
    %9 = vector.broadcast %8 : f32 to vector<2x128xf32>
    %10 = arith.mulf %1, %9 : vector<2x128xf32>
    %c0_13 = arith.constant 0 : index
    %11 = memref.load %arg4[%c0_13] : memref<3xf32, #tpu.memory_space<smem>>
    %12 = vector.broadcast %11 : f32 to vector<2x128xf32>
    %13 = arith.addf %10, %12 : vector<2x128xf32>
    %c1_14 = arith.constant 1 : index
    %14 = memref.load %arg3[%c1_14] : memref<12xf32, #tpu.memory_space<smem>>
    %15 = vector.broadcast %14 : f32 to vector<2x128xf32>
    %16 = arith.mulf %3, %15 : vector<2x128xf32>
    %17 = arith.addf %13, %16 : vector<2x128xf32>
    %c2_15 = arith.constant 2 : index
    %18 = memref.load %arg3[%c2_15] : memref<12xf32, #tpu.memory_space<smem>>
    %19 = vector.broadcast %18 : f32 to vector<2x128xf32>
    %20 = arith.mulf %5, %19 : vector<2x128xf32>
    %21 = arith.addf %17, %20 : vector<2x128xf32>
    %c3_16 = arith.constant 3 : index
    %22 = memref.load %arg3[%c3_16] : memref<12xf32, #tpu.memory_space<smem>>
    %23 = vector.broadcast %22 : f32 to vector<2x128xf32>
    %24 = arith.mulf %7, %23 : vector<2x128xf32>
    %25 = arith.addf %21, %24 : vector<2x128xf32>
    %c0_17 = arith.constant 0 : index
    %c0_18 = arith.constant 0 : index
    %c0_19 = arith.constant 0 : index
    %c0_20 = arith.constant 0 : index
    %26 = vector.load %arg5[%c0_17, %c0_18, %c0_19, %c0_20] : memref<1x3x2x128xf32, #tpu.memory_space<vmem>>, vector<1x1x2x128xf32>
    %27 = vector.shape_cast %26 : vector<1x1x2x128xf32> to vector<2x128xf32>
    %28 = vector.shape_cast %25 : vector<2x128xf32> to vector<1x1x2x128xf32>
    tpu.vector_store %arg5[%c0_17, %c0_18, %c0_19, %c0_20], %28 {strides = array<i32>} : memref<1x3x2x128xf32, #tpu.memory_space<vmem>>, vector<1x1x2x128xf32>,
    %c4 = arith.constant 4 : index
    %29 = memref.load %arg3[%c4] : memref<12xf32, #tpu.memory_space<smem>>
    %30 = vector.broadcast %29 : f32 to vector<2x128xf32>
    %31 = arith.mulf %1, %30 : vector<2x128xf32>
    %c1_21 = arith.constant 1 : index
    %32 = memref.load %arg4[%c1_21] : memref<3xf32, #tpu.memory_space<smem>>
    %33 = vector.broadcast %32 : f32 to vector<2x128xf32>
    %34 = arith.addf %31, %33 : vector<2x128xf32>
    %c5 = arith.constant 5 : index
    %35 = memref.load %arg3[%c5] : memref<12xf32, #tpu.memory_space<smem>>
    %36 = vector.broadcast %35 : f32 to vector<2x128xf32>
    %37 = arith.mulf %3, %36 : vector<2x128xf32>
    %38 = arith.addf %34, %37 : vector<2x128xf32>
    %c6 = arith.constant 6 : index
    %39 = memref.load %arg3[%c6] : memref<12xf32, #tpu.memory_space<smem>>
    %40 = vector.broadcast %39 : f32 to vector<2x128xf32>
    %41 = arith.mulf %5, %40 : vector<2x128xf32>
    %42 = arith.addf %38, %41 : vector<2x128xf32>
    %c7 = arith.constant 7 : index
    %43 = memref.load %arg3[%c7] : memref<12xf32, #tpu.memory_space<smem>>
    %44 = vector.broadcast %43 : f32 to vector<2x128xf32>
    %45 = arith.mulf %7, %44 : vector<2x128xf32>
    %46 = arith.addf %42, %45 : vector<2x128xf32>
    %c0_22 = arith.constant 0 : index
    %c1_23 = arith.constant 1 : index
    %c0_24 = arith.constant 0 : index
    %c0_25 = arith.constant 0 : index
    %47 = vector.load %arg5[%c0_22, %c1_23, %c0_24, %c0_25] : memref<1x3x2x128xf32, #tpu.memory_space<vmem>>, vector<1x1x2x128xf32>
    %48 = vector.shape_cast %47 : vector<1x1x2x128xf32> to vector<2x128xf32>
    %49 = vector.shape_cast %46 : vector<2x128xf32> to vector<1x1x2x128xf32>
    tpu.vector_store %arg5[%c0_22, %c1_23, %c0_24, %c0_25], %49 {strides = array<i32>} : memref<1x3x2x128xf32, #tpu.memory_space<vmem>>, vector<1x1x2x128xf32>,
    %c8 = arith.constant 8 : index
    %50 = memref.load %arg3[%c8] : memref<12xf32, #tpu.memory_space<smem>>
    %51 = vector.broadcast %50 : f32 to vector<2x128xf32>
    %52 = arith.mulf %1, %51 : vector<2x128xf32>
    %c2_26 = arith.constant 2 : index
    %53 = memref.load %arg4[%c2_26] : memref<3xf32, #tpu.memory_space<smem>>
    %54 = vector.broadcast %53 : f32 to vector<2x128xf32>
    %55 = arith.addf %52, %54 : vector<2x128xf32>
    %c9 = arith.constant 9 : index
    %56 = memref.load %arg3[%c9] : memref<12xf32, #tpu.memory_space<smem>>
    %57 = vector.broadcast %56 : f32 to vector<2x128xf32>
    %58 = arith.mulf %3, %57 : vector<2x128xf32>
    %59 = arith.addf %55, %58 : vector<2x128xf32>
    %c10 = arith.constant 10 : index
    %60 = memref.load %arg3[%c10] : memref<12xf32, #tpu.memory_space<smem>>
    %61 = vector.broadcast %60 : f32 to vector<2x128xf32>
    %62 = arith.mulf %5, %61 : vector<2x128xf32>
    %63 = arith.addf %59, %62 : vector<2x128xf32>
    %c11 = arith.constant 11 : index
    %64 = memref.load %arg3[%c11] : memref<12xf32, #tpu.memory_space<smem>>
    %65 = vector.broadcast %64 : f32 to vector<2x128xf32>
    %66 = arith.mulf %7, %65 : vector<2x128xf32>
    %67 = arith.addf %63, %66 : vector<2x128xf32>
    %c0_27 = arith.constant 0 : index
    %c2_28 = arith.constant 2 : index
    %c0_29 = arith.constant 0 : index
    %c0_30 = arith.constant 0 : index
    %68 = vector.load %arg5[%c0_27, %c2_28, %c0_29, %c0_30] : memref<1x3x2x128xf32, #tpu.memory_space<vmem>>, vector<1x1x2x128xf32>
    %69 = vector.shape_cast %68 : vector<1x1x2x128xf32> to vector<2x128xf32>
    %70 = vector.shape_cast %67 : vector<2x128xf32> to vector<1x1x2x128xf32>
    tpu.vector_store %arg5[%c0_27, %c2_28, %c0_29, %c0_30], %70 {strides = array<i32>} : memref<1x3x2x128xf32, #tpu.memory_space<vmem>>, vector<1x1x2x128xf32>,
    return
  }
  func.func @transform_0(%arg0: i32, %arg1: i32) -> (i32, i32, i32, i32) {
    %c0_i32 = arith.constant 0 : i32
    %c0_i32_0 = arith.constant 0 : i32
    %c0_i32_1 = arith.constant 0 : i32
    return %arg0, %c0_i32, %arg1, %c0_i32_0 : i32, i32, i32, i32
  }
  func.func @transform_1(%arg0: i32, %arg1: i32) -> i32 {
    %c0_i32 = arith.constant 0 : i32
    %c0_i32_0 = arith.constant 0 : i32
    return %c0_i32 : i32
  }
  func.func @transform_2(%arg0: i32, %arg1: i32) -> i32 {
    %c0_i32 = arith.constant 0 : i32
    %c0_i32_0 = arith.constant 0 : i32
    return %c0_i32 : i32
  }
  func.func @transform_3(%arg0: i32, %arg1: i32) -> (i32, i32, i32, i32) {
    %c0_i32 = arith.constant 0 : i32
    %c0_i32_0 = arith.constant 0 : i32
    %c0_i32_1 = arith.constant 0 : i32
    return %arg0, %c0_i32, %arg1, %c0_i32_0 : i32, i32, i32, i32
  }
}

</mosaic_0001>

<bundles_post_ra>
// kernel: tpu_custom_call.1
= control target key start
LH: loop header
LB: loop body
LE: loop exit
PB: predicated region body
PF: predicated region fallthrough
CT: control target
= control target key end

     0   :  { %s908_s0 = inlined_call_operand.hbm [shape: f32[2,4,2,128], index: 0, kind: input, shape index: {}]   ;;  %s909_s1 = inlined_call_operand.vmem [shape: f32[12], index: 1, kind: input, shape index: {}]   ;;  %s910_s2 = inlined_call_operand.vmem [shape: f32[3], index: 2, kind: input, shape index: {}]   ;;  %s911_s3 = inlined_call_operand.hbm [shape: f32[2,3,2,128], index: 3, kind: output, shape index: {}]  }
   0x1   :  { %918 = sst [smem:[#allocation14_spill]] %s909_s1 }
   0x2   :  { %8 = vsyncpa [#allocation3], 0 }
   0x3   :  { %10 = vsyncpa [#allocation3 + $0x1], 0 }
   0x4   :  { %11 = vsyncpa [#allocation5], 0 }
   0x5   :  { %12 = vsyncpa [#allocation8], 0 }
   0x6   :  { %13 = vsyncpa [#allocation4], 0 }
   0x7   :  { %15 = vsyncpa [#allocation4 + $0x1], 0  ;;  %s721_s12 = smov 0   ;;  %s723_s13 = smov 0  }
   0x8   :  { %s725_s14 = smov 0   ;;  %s727_s15 = smov 0  }
   0x9   :  { %s729_s16 = smov 0   ;;  %s731_s17 = smov 0  }
   0xa LB: > { %s421_s18 = sadd.s32 4294967295, %s691_s17   ;;  %s422_s19 = sadd.s32 4294967294, %s691_s17   ;;  %s691_s17 = sphi %s731_s17, %s21_s17   ;;  %s687_s16 = sphi %s729_s16, %s939_s16   ;;  %s683_s15 = sphi %s727_s15, %s938_s15   ;;  %s679_s14 = sphi %s725_s14, %s937_s14   ;;  %s675_s13 = sphi %s723_s13, %s936_s13   ;;  %s671_s12 = sphi %s721_s12, %s935_s12  }
   0xb   : > { %s42_s20 = sadd.s32 1, %s679_s14  ;;  %p49_p0 = scmp.ne.s32.totalorder %s679_s14, %s675_s13 }
   0xc   : > { %p50_p1 = scmp.eq.s32.totalorder %s691_s17, 0  ;;  %p55_p2 = scmp.ne.s32.totalorder %s675_s13, %s671_s12 }
   0xd   : > { %p759_p3 = scmp.eq.s32.totalorder %s421_s18, 0  ;;  %p123_p4 = scmp.eq.s32.totalorder %s421_s18, 1 }
   0xe   : > { %p763_p5 = por %p50_p1, %p49_p0  ;;  %p129_p6 = scmp.eq.s32.totalorder %s422_s19, 1 }
   0xf   : > { %s919_s21 = scalar_select %p759_p3, 1, 0 }
  0x10   : > { %p769_p7 = por %p759_p3, %p55_p2  ;;  %p773_p8 = por %p123_p4, %p49_p0 }
  0x11   : > { %p777_p9 = por %p129_p6, %p55_p2  ;;  %p423_p10 = scmp.ge.s32.totalorder %s691_s17, 1 }
  0x12   : > { %s921_s23 = scalar_select %p769_p7, 1, 0 }
  0x13   : > { %s922_s24 = scalar_select %p773_p8, 1, 0 }
  0x14   : > { %s923_s25 = scalar_select %p777_p9, 1, 0 }
  0x15   : > { %p136_p11 = scmp.lt.s32.totalorder %s691_s17, 3  ;;  %s924_s1 = sld [smem:[#allocation14_spill]] }
  0x16   : > { %p487_p0 = scmp.lt.s32.totalorder %s691_s17, 2  ;;  %s160_s5 = sshll.u32 %s910_s2, 4  ;;  %s161_s5 = int_to_ptr.vmem [resolvable:$true] %s160_s5 }
  0x17   : > { %p786_p12 = pnand %p423_p10, %p136_p11 }
  0x18   : > { %p799_p2 = pnand %p487_p0, %p763_p5 }
  0x19   : > { %s925_s29 = scalar_select %p786_p12, 1, 0 }
  0x1a   : > { %p470_p1 = pneg %p786_p12 }
  0x1b   : > { %s149_s28 = sshll.u32 %s924_s1, 4  ;;  %s150_s28 = int_to_ptr.vmem [resolvable:$true] %s149_s28 }
  0x1c   : > { %s926_s6 = scalar_select %p799_p2, 1, 0 }
  0x1d   : > { %p805_p4 = pnand %p470_p1, %p759_p3  ;;  %s545_s8 = scalar_lea.vmem %s150_s28, 16 }
  0x1e   : > { %p546_p6 = scmp.ne.s32.totalorder %s150_s28, %s545_s8  ;;  %p553_p9 = scmp.lt.s32.totalorder %s150_s28, %s150_s28 }
  0x1f   : > { %p547_p10 = pneg %p805_p4  ;;  %p554_p8 = scmp.lt.s32.totalorder %s545_s8, %s545_s8 }
  0x21   : > { %p548_p11 = pnand %p547_p10, %p546_p6  ;;  %p555_p7 = por %p554_p8, %p553_p9 }
  0x23   : > { %p549_p13 = pneg %p548_p11 }
  0x25   : > { %p556_p5 = pnand %p555_p7, %p549_p13 }
  0x27   : > { %559 = shalt.err (!%p556_p5)
}
  0x28   : > { %s693_s9 = smov [#allocation6]   ;;  %s560_s10 = scalar_lea.vmem %s161_s5, 16 }
  0x29   : > { %473 = dma.vmem_to_smem (!%p805_p4), %s150_s28, 16, %s693_s9, [#allocation5]  }
  0x2a   : > { %p561_p0 = scmp.ne.s32.totalorder %s161_s5, %s560_s10  ;;  %p568_p12 = scmp.lt.s32.totalorder %s161_s5, %s161_s5 }
  0x2b   : > { %p569_p2 = scmp.lt.s32.totalorder %s560_s10, %s560_s10 }
  0x2c   : > { %p563_p1 = pnand %p561_p0, %p547_p10 }
  0x2d   : > { %p570_p6 = por %p569_p2, %p568_p12 }
  0x2e   : > { %p564_p3 = pneg %p563_p1 }
  0x30   : > { %p571_p11 = pnand %p570_p6, %p564_p3 }
  0x32   : > { %574 = shalt.err (!%p571_p11)
}
  0x33   : > { %s694_s11 = smov [#allocation7]   ;;  %s33_s18 = sadd.s32 1, %s687_s16 }
  0x34   : > { %476 = dma.vmem_to_smem (!%p805_p4), %s161_s5, 16, %s694_s11, [#allocation8]  }
  0x35   : > { %s171_s19 = sand.u32 1, %s679_s14   ;;  %p35_p7 = scmp.ge.s32.totalorder %s33_s18, 2 }
  0x36   : > { %s427_s22 = sshll.u32 %s171_s19, 3  ;;  %s455_s26 = sshll.u32 %s687_s16, 7 }
  0x37   : > { %s941_s18 = smov (%p35_p7, %s33_s18), 0  ;;  %s182_s30 = scalar_lea.hbm %s908_s0, %s455_s26 }
  0x38   : > { %s37_s4 = ssub.s32 %s687_s16, %s941_s18  ;;  %s175_s7 = scalar_lea.vmem [#allocation2], %s427_s22 }
  0x39   : > { %s183_s8 = sshll.u32 %s175_s7, 4  ;;  %p40_p3 = scmp.eq.s32.totalorder %s37_s4, 0  ;;  %s184_s8 = int_to_ptr.vmem [resolvable:$true] %s183_s8 }
  0x3a   : > { %s172_s5 = scalar_lea.sflag [#allocation3], %s171_s19  ;;  %p928_p8 = scmp.ne.s32.totalorder %s926_s6, 0 }
  0x3b   : > { %s828_s9 = scalar_select %p40_p3, %s679_s14, %s42_s20  }
  0x3c   : > { %p577_p9 = pneg %p928_p8  ;;  %s588_s10 = scalar_lea.vmem %s184_s8, 128 }
  0x3d   : > { %p589_p12 = scmp.ne.s32.totalorder %s184_s8, %s588_s10  ;;  %s695_s11 = smov [#allocation2]  }
  0x3e   : > { %s593_s1 = sshll.u32 %s695_s11, 4  ;;  %s594_s1 = int_to_ptr.vmem [resolvable:$false] %s593_s1 }
  0x3f   : > { %p591_p13 = pnand %p589_p12, %p577_p9  ;;  %s595_s27 = scalar_lea.vmem %s594_s1, 256 }
  0x40   : > { %p596_p4 = scmp.lt.s32.totalorder %s184_s8, %s594_s1  ;;  %p597_p10 = scmp.lt.s32.totalorder %s595_s27, %s588_s10 }
  0x41   : > { %p592_p2 = pneg %p591_p13 }
  0x42   : > { %p598_p5 = por %p597_p10, %p596_p4 }
  0x44   : > { %p599_p0 = pnand %p598_p5, %p592_p2 }
  0x46   : > { %602 = shalt.err (!%p599_p0)
}
  0x47   : > { %s696_s22 = smov 32   ;;  %s697_s20 = smov 2  }
  0x48   : > { %480 = dma.hbm_to_vmem [thread:$0]  (!%p928_p8), %s182_s30, 128, %s184_s8, %s172_s5, %s696_s22, %s696_s22, %s697_s20  }
  0x49   : > { %p929_p1 = scmp.ne.s32.totalorder %s925_s29, 0 }
  0x4a   : > { %s837_s19 = sand.u32 (!%p929_p1), 1, %s675_s13   ;;  %p930_p6 = scmp.ne.s32.totalorder (!%p929_p1), %s921_s23, 0 }
  0x4b   : > { %195 = sbr.rel (%p929_p1) target bundleno = 129 (0x81), region = 32  ;;  %s431_s26 = sshll.u32 (!%p929_p1), %s837_s19, 3 }
  0x4c   : > { %s198_s1 = scalar_lea.sflag (!%p929_p1), [#allocation3], %s837_s19  ;;  %s201_s28 = scalar_lea.vmem (!%p929_p1), [#allocation2], %s431_s26 }
  0x50   : > { %654 = dma.done.wait (%p930_p6), %s198_s1, 128  }
  0x51   : > { %656 = vsyncadd (%p930_p6), %s198_s1, 4294967168  ;;  %p931_p11 = scmp.ne.s32.totalorder %s919_s21, 0 }
  0x53   : > { %658 = dma.done.wait (%p931_p11), [#allocation5], 16  }
  0x54   : > { %660 = vsyncadd (%p931_p11), [#allocation5], 4294967280 }
  0x55   : > { %662 = dma.done.wait (%p931_p11), [#allocation8], 16  }
  0x56   : > { %664 = vsyncadd (%p931_p11), [#allocation8], 4294967280 }
  0x57   : > { %214 = sfence }
  0x58   : > { %s240_s29 = sld [smem:[#allocation6]]  ;;  %v233_v0 = vld [vmem:[%s201_s28] sm:$0x3]  ;;  %v434_v1 = vld [vmem:[%s201_s28 + $0x2] sm:$0x3]  ;;  %s456_s11 = smul.u32 6, %s837_s19 }
  0x59   : > { %s243_s6 = sld [smem:[#allocation7]]  ;;  %v435_v3 = vld [vmem:[%s201_s28 + $0x4] sm:$0x3]  ;;  %v436_v6 = vld [vmem:[%s201_s28 + $0x6] sm:$0x3]  ;;  %p932_p3 = scmp.ne.s32.totalorder %s922_s24, 0 }
  0x5a   : > { %s437_s30 = sld [smem:[#allocation6 + $0x1]]  ;;  %s232_s28 = scalar_lea.vmem [#allocation9], %s456_s11 }
  0x5b   : > { %s438_s4 = sld [smem:[#allocation6 + $0x2]] }
  0x5c   : > { %s439_s23 = sld [smem:[#allocation6 + $0x3]] }
  0x5d   : > { %s440_s7 = sld [smem:[#allocation6 + $0x4]] }
  0x5e   : > { %v241_v2 = vstv %s240_s29  ;;  %s441_s8 = sld [smem:[#allocation7 + $0x1]]  ;;  %s314_s29 = sshll.u32 %s232_s28, 4  ;;  %s855_s29 = int_to_ptr.vmem [resolvable:$true] %s314_s29 }
  0x5f   : > { %v242_v4 = vmul.f32 %v241_v2, %v233_v0  ;;  %v244_v5 = vstv %s243_s6  ;;  %s442_s5 = sld [smem:[#allocation6 + $0x5]]  ;;  %s457_s6 = smul.u32 96, %s683_s15 }
  0x60   : > { %v247_v7 = vstv %s437_s30  ;;  %s443_s21 = sld [smem:[#allocation6 + $0x6]]  ;;  %s698_s15 = smov [#allocation9]  }
  0x61   : > { %v245_v8 = vadd.f32 %v244_v5, %v242_v4  ;;  %v248_v9 = vmul.f32 %v434_v1, %v247_v7  ;;  %v251_v10 = vstv %s438_s4  ;;  %s444_s10 = sld [smem:[#allocation6 + $0x7]] }
  0x62   : > { %v252_v11 = vmul.f32 %v435_v3, %v251_v10  ;;  %v255_v12 = vstv %s439_s23  ;;  %s446_s27 = sld [smem:[#allocation6 + $0x8]]  ;;  %s860_s23 = scalar_lea.hbm %s911_s3, %s457_s6 }
  0x63   : > { %v249_v13 = vadd.f32 %v248_v9, %v245_v8  ;;  %v256_v14 = vmul.f32 %v436_v6, %v255_v12  ;;  %v260_v15 = vstv %s440_s7  ;;  %s447_s22 = sld [smem:[#allocation7 + $0x2]]  ;;  %s300_s7 = scalar_lea.sflag [#allocation4], %s837_s19 }
  0x64   : > { %v261_v16 = vmul.f32 %v260_v15, %v233_v0  ;;  %v263_v17 = vstv %s441_s8  ;;  %s448_s20 = sld [smem:[#allocation6 + $0x9]]  ;;  %s603_s8 = scalar_lea.vmem %s855_s29, 96 }
  0x65   : > { %v253_v18 = vadd.f32 %v252_v11, %v249_v13  ;;  %v266_v19 = vstv %s442_s5  ;;  %s449_s26 = sld [smem:[#allocation6 + $0xa]]  ;;  %p604_p7 = scmp.ne.s32.totalorder %s855_s29, %s603_s8 }
  0x66   : > { %v264_v20 = vadd.f32 %v263_v17, %v261_v16  ;;  %v267_v21 = vmul.f32 %v434_v1, %v266_v19  ;;  %v270_v22 = vstv %s443_s21  ;;  %s450_s1 = sld [smem:[#allocation6 + $0xb]]  ;;  %s607_s5 = sshll.u32 %s698_s15, 4  ;;  %s608_s5 = int_to_ptr.vmem [resolvable:$false] %s607_s5 }
  0x67   : > { %v257_v23 = vadd.f32 %v256_v14, %v253_v18  ;;  %v271_v24 = vmul.f32 %v435_v3, %v270_v22  ;;  %v274_v25 = vstv %s444_s10  ;;  %p605_p8 = pnand %p604_p7, %p932_p3  ;;  %s609_s21 = scalar_lea.vmem %s608_s5, 192 }
  0x68   : > { %v268_v26 = vadd.f32 %v267_v21, %v264_v20  ;;  %v275_v27 = vmul.f32 %v436_v6, %v274_v25  ;;  %v280_v28 = vstv %s446_s27  ;;  %p610_p12 = scmp.lt.s32.totalorder %s855_s29, %s608_s5  ;;  %p611_p13 = scmp.lt.s32.totalorder %s609_s21, %s603_s8 }
  0x69   : > { %258 = vst [vmem:[%s232_s28] sm:$0x3] %v257_v23  ;;  %v281_v29 = vmul.f32 %v280_v28, %v233_v0  ;;  %v283_v30 = vstv %s447_s22  ;;  %p606_p9 = pneg %p605_p8 }
  0x6a   : > { %v272_v31 = vadd.f32 %v271_v24, %v268_v26  ;;  %v286_v32 = vstv %s448_s20  ;;  %p612_p2 = por %p611_p13, %p610_p12 }
  0x6b   : > { %v284_v33 = vadd.f32 %v283_v30, %v281_v29  ;;  %v287_v34 = vmul.f32 %v434_v1, %v286_v32  ;;  %v290_v35 = vstv %s449_s26 }
  0x6c   : > { %v276_v36 = vadd.f32 %v275_v27, %v272_v31  ;;  %v291_v37 = vmul.f32 %v435_v3, %v290_v35  ;;  %v294_v38 = vstv %s450_s1  ;;  %p613_p4 = pnand %p612_p2, %p606_p9 }
  0x6d   : > { %v288_v39 = vadd.f32 %v287_v34, %v284_v33  ;;  %v295_v40 = vmul.f32 %v436_v6, %v294_v38 }
  0x6e   : > { %445 = vst [vmem:[%s232_s28 + $0x2] sm:$0x3] %v276_v36 }
  0x6f   : > { %v292_v41 = vadd.f32 %v291_v37, %v288_v39 }
  0x71   : > { %v296_v42 = vadd.f32 %v295_v40, %v292_v41 }
  0x73   : > { %451 = vst [vmem:[%s232_s28 + $0x4] sm:$0x3] %v296_v42 }
  0x74   : > { %616 = shalt.err (!%p613_p4)
}
  0x75   : > { %s617_s10 = scalar_lea.hbm %s860_s23, 96  ;;  %s621_s22 = scalar_lea.hbm %s911_s3, 192 }
  0x76   : > { %p618_p10 = scmp.ne.s32.totalorder %s860_s23, %s617_s10  ;;  %p622_p1 = scmp.lt.s32.totalorder %s860_s23, %s911_s3 }
  0x77   : > { %p623_p6 = scmp.lt.s32.totalorder %s621_s22, %s617_s10 }
  0x78   : > { %p619_p5 = pnand %p618_p10, %p932_p3 }
  0x79   : > { %p624_p11 = por %p623_p6, %p622_p1 }
  0x7a   : > { %p620_p0 = pneg %p619_p5 }
  0x7c   : > { %p625_p7 = pnand %p624_p11, %p620_p0 }
  0x7e   : > { %628 = shalt.err (!%p625_p7)
}
  0x7f   : > { %s699_s1 = smov 32   ;;  %s700_s28 = smov 2  }
  0x80   : > { %468 = dma.vmem_to_hbm [thread:$0]  (%p932_p3), %s855_s29, 96, %s860_s23, %s300_s7, %s699_s1, %s699_s1, %s700_s28  }
  0x81 PF: > { %s329_s6 = sand.u32 1, %s671_s12   ;;  %p933_p8 = scmp.ne.s32.totalorder %s923_s25, 0 }
  0x82   : > { %p934_p9 = scmp.ge.s32.totalorder %s691_s17, 2  ;;  %s330_s30 = scalar_lea.sflag [#allocation4], %s329_s6 }
  0x84   : > { %p482_p12 = pnand %p934_p9, %p933_p8 }
  0x86   : > { %p483_p13 = pneg %p482_p12 }
  0x88   : > { %666 = dma.done.wait (%p483_p13), %s330_s30, 96  }
  0x89   : > { %668 = vsyncadd (%p483_p13), %s330_s30, 4294967200  ;;  %s21_s17 = sadd.s32 1, %s691_s17   ;;  %s935_s12 = smov %s675_s13 }
  0x8a   : > { %p18_p2 = scmp.ge.s32.totalorder %s21_s17, 4   ;;  %s936_s13 = smov %s679_s14 }
  0x8b   : > { %s937_s14 = smov %s828_s9  ;;  %s938_s15 = smov %s687_s16 }
  0x8c   : > { %s939_s16 = smov %s941_s18  ;;  %20 = sbr.rel (!%p18_p2) target bundleno = 10 (0xa), region = 91 }
  0x91   :  { %335 = vsyncpa [#allocation3], 1 }
  0x92   :  { %337 = vsyncpa [#allocation3 + $0x1], 1 }
  0x93   :  { %338 = vsyncpa [#allocation4], 1 }
  0x94   :  { %340 = vsyncpa [#allocation4 + $0x1], 1 }
  0x95   :  { %341 = vsyncpa [#allocation5], 1 }
  0x96   :  { %343 = vsyncpa [#allocation5 + $0x1], 1 }
  0x97   :  { %344 = vsyncpa [#allocation8], 1 }

</bundles_post_ra>
